<compile_context>
chip_gen: v6e
topology: v6e:2x2x1
jax: 0.10.0
libtpu: 0.0.40
codegen_flags: <defaults>
</compile_context>

<pallas_src>
import functools

import jax
import jax.numpy as jnp
from jax.experimental import pallas as pl
from jax.experimental.pallas import tpu as pltpu


def sdpa_kernel(q_ref, k_ref, v_ref, o_ref, attn_ref, *, inv_temperature):
    # q_ref: (TB, Lq, D), k_ref: (TB, Lk, D), v_ref: (TB, Lk, Dv)
    q = q_ref[...]
    k = k_ref[...]
    v = v_ref[...]

    # attn = bmm(q, k^T) / temperature      -> (TB, Lq, Lk), f32 accumulation on the MXU
    s = jnp.einsum("bqd,bkd->bqk", q, k, preferred_element_type=jnp.float32)
    s = s * inv_temperature

    # TODO(synk): optional `gate` (attn *= gate.repeat(2,1,1)) and `mask`
    # (attn = where(mask==0, 1e-8, mask)) branches of the PyTorch forward are not
    # exercised in the default call path and are not implemented here.

    # softmax over the key axis (dim=2), numerically stable
    m = jnp.max(s, axis=-1, keepdims=True)
    e = jnp.exp(s - m)
    denom = jnp.sum(e, axis=-1, keepdims=True)
    p = e * pl.reciprocal(denom, approx=True)

    # TODO(synk): nn.Dropout(attn_dropout) is identity in eval mode; train-mode dropout
    # (pltpu.prng_seed + stateful_bernoulli) is not implemented here.

    attn_ref[...] = p.astype(attn_ref.dtype)
    # output = bmm(attn, va)                -> (TB, Lq, Dv)
    o_ref[...] = jnp.einsum(
        "bqk,bkd->bqd", p, v, preferred_element_type=jnp.float32
    ).astype(o_ref.dtype)


def scaled_dot_product_attention(qu, ke, va, temperature, *, batch_tile=None):
    """qu: (B, Lq, D), ke: (B, Lk, D), va: (B, Lk, Dv)  ->  (out (B,Lq,Dv), attn (B,Lq,Lk))."""
    B, Lq, D = qu.shape
    Bk, Lk, Dk = ke.shape
    Bv, Lv, Dv = va.shape
    assert Bk == B and Bv == B and Dk == D and Lv == Lk

    if batch_tile is None:
        # Aim for ~256 matmul rows per grid step (fills MXU height on v6e/v7x),
        # but keep at least 2 grid steps so both v7x TensorCores get work.
        TB = max(1, min(B, 256 // max(Lq, 1)))
        if B >= 2:
            TB = max(1, min(TB, B // 2))
        while B % TB != 0:
            TB -= 1
    else:
        TB = batch_tile
    assert B % TB == 0, (B, TB)
    grid = (B // TB,)

    kern = functools.partial(sdpa_kernel, inv_temperature=float(1.0 / temperature))

    out, attn = pl.pallas_call(
        kern,
        out_shape=(
            jax.ShapeDtypeStruct((B, Lq, Dv), qu.dtype),
            jax.ShapeDtypeStruct((B, Lq, Lk), qu.dtype),
        ),
        grid_spec=pltpu.PrefetchScalarGridSpec(
            num_scalar_prefetch=0,
            grid=grid,
            in_specs=[
                pl.BlockSpec((TB, Lq, D), lambda b: (b, 0, 0)),
                pl.BlockSpec((TB, Lk, D), lambda b: (b, 0, 0)),
                pl.BlockSpec((TB, Lk, Dv), lambda b: (b, 0, 0)),
            ],
            out_specs=[
                pl.BlockSpec((TB, Lq, Dv), lambda b: (b, 0, 0)),
                pl.BlockSpec((TB, Lq, Lk), lambda b: (b, 0, 0)),
            ],
        ),
        compiler_params=pltpu.CompilerParams(dimension_semantics=("parallel",)),
    )(qu, ke, va)
    return out, attn


if __name__ == "__main__":
    # Small shapes consistent with the module's forward.
    B, Lq, Lk, D, Dv = 4, 16, 16, 32, 32
    temperature = D ** 0.5  # standard choice for the constructor's `temperature`

    key = jax.random.PRNGKey(0)
    kq, kk, kv = jax.random.split(key, 3)
    qu = jax.random.normal(kq, (B, Lq, D), dtype=jnp.float32)
    ke = jax.random.normal(kk, (B, Lk, D), dtype=jnp.float32)
    va = jax.random.normal(kv, (B, Lk, Dv), dtype=jnp.float32)

    out, attn = scaled_dot_product_attention(qu, ke, va, temperature)
    out = jax.block_until_ready(out)
    attn = jax.block_until_ready(attn)

    # Pure-JAX reference of the same PyTorch forward (mask=None, gate=None, eval dropout).
    s_ref = jnp.einsum("bqd,bkd->bqk", qu, ke) / temperature
    p_ref = jax.nn.softmax(s_ref, axis=2)
    out_ref = jnp.einsum("bqk,bkd->bqd", p_ref, va)

    assert out.shape == (B, Lq, Dv), out.shape
    assert attn.shape == (B, Lq, Lk), attn.shape
    assert jnp.allclose(attn, p_ref, atol=2e-3, rtol=2e-3), float(
        jnp.max(jnp.abs(attn - p_ref))
    )
    assert jnp.allclose(out, out_ref, atol=2e-3, rtol=2e-3), float(
        jnp.max(jnp.abs(out - out_ref))
    )
    print("KERNEL_OK")
</pallas_src>

<mosaic_0001>
module attributes {stable_mosaic.version = 11 : i64} {
  func.func @sdpa_kernel(%arg0: i32, %arg1: memref<2x16x32xf32, #tpu.memory_space<vmem>>, %arg2: memref<2x16x32xf32, #tpu.memory_space<vmem>>, %arg3: memref<2x16x32xf32, #tpu.memory_space<vmem>>, %arg4: memref<2x16x32xf32, #tpu.memory_space<vmem>>, %arg5: memref<2x16x16xf32, #tpu.memory_space<vmem>>) attributes {dimension_semantics = [#tpu.dimension_semantics<parallel>], iteration_bounds = array<i64: 2>, scalar_prefetch = 0 : i64, scratch_operands = 0 : i64, tpu.core_type = #tpu.core_type<tc>, window_params = [{transform_indices = @transform_0, window_bounds = array<i64: 2, 16, 32>}, {transform_indices = @transform_1, window_bounds = array<i64: 2, 16, 32>}, {transform_indices = @transform_2, window_bounds = array<i64: 2, 16, 32>}, {transform_indices = @transform_3, window_bounds = array<i64: 2, 16, 32>}, {transform_indices = @transform_4, window_bounds = array<i64: 2, 16, 16>}]} {
    %c0 = arith.constant 0 : index
    %c0_0 = arith.constant 0 : index
    %c0_1 = arith.constant 0 : index
    %0 = vector.load %arg1[%c0, %c0_0, %c0_1] : memref<2x16x32xf32, #tpu.memory_space<vmem>>, vector<2x16x32xf32>
    %c0_2 = arith.constant 0 : index
    %c0_3 = arith.constant 0 : index
    %c0_4 = arith.constant 0 : index
    %1 = vector.load %arg2[%c0_2, %c0_3, %c0_4] : memref<2x16x32xf32, #tpu.memory_space<vmem>>, vector<2x16x32xf32>
    %c0_5 = arith.constant 0 : index
    %c0_6 = arith.constant 0 : index
    %c0_7 = arith.constant 0 : index
    %2 = vector.load %arg3[%c0_5, %c0_6, %c0_7] : memref<2x16x32xf32, #tpu.memory_space<vmem>>, vector<2x16x32xf32>
    "tpu.trace_start"() <{level = 10 : i32, message = "bqd,bkd->bqk"}> : () -> ()
    %cst = arith.constant dense<0.000000e+00> : vector<2x16x16xf32>
    %3 = tpu.matmul %0, %1, %cst {dimension_numbers = #tpu.dot_dimension_numbers<[2], [2], [1], [1], [0, 0, 0, 1, 1, 1], [0], [0]>} : vector<2x16x32xf32>, vector<2x16x32xf32>, vector<2x16x16xf32> -> vector<2x16x16xf32>
    "tpu.trace_stop"() : () -> ()
    %cst_8 = arith.constant 0.176776692 : f32
    %4 = vector.broadcast %cst_8 : f32 to vector<2x16x16xf32>
    %5 = arith.mulf %3, %4 : vector<2x16x16xf32>
    %cst_9 = arith.constant dense<0xFF800000> : vector<2x16xf32>
    %6 = vector.multi_reduction <maximumf>, %5, %cst_9 [2] : vector<2x16x16xf32> to vector<2x16xf32>
    %7 = vector.shape_cast %6 : vector<2x16xf32> to vector<2x16x1xf32>
    %8 = vector.broadcast %7 : vector<2x16x1xf32> to vector<2x16x16xf32>
    %9 = arith.subf %5, %8 : vector<2x16x16xf32>
    %10 = math.exp %9 : vector<2x16x16xf32>
    %cst_10 = arith.constant dense<0.000000e+00> : vector<2x16xf32>
    %11 = vector.multi_reduction <add>, %10, %cst_10 [2] : vector<2x16x16xf32> to vector<2x16xf32>
    %12 = vector.shape_cast %11 : vector<2x16xf32> to vector<2x16x1xf32>
    %13 = tpu.reciprocal %12 {approx = true} : vector<2x16x1xf32> -> vector<2x16x1xf32>
    %14 = vector.broadcast %13 : vector<2x16x1xf32> to vector<2x16x16xf32>
    %15 = arith.mulf %10, %14 : vector<2x16x16xf32>
    %c0_11 = arith.constant 0 : index
    %c0_12 = arith.constant 0 : index
    %c0_13 = arith.constant 0 : index
    %16 = vector.load %arg5[%c0_11, %c0_12, %c0_13] : memref<2x16x16xf32, #tpu.memory_space<vmem>>, vector<2x16x16xf32>
    tpu.vector_store %arg5[%c0_11, %c0_12, %c0_13], %15 {strides = array<i32>} : memref<2x16x16xf32, #tpu.memory_space<vmem>>, vector<2x16x16xf32>,
    "tpu.trace_start"() <{level = 10 : i32, message = "bqk,bkd->bqd"}> : () -> ()
    %cst_14 = arith.constant dense<0.000000e+00> : vector<2x16x32xf32>
    %17 = tpu.matmul %15, %2, %cst_14 {dimension_numbers = #tpu.dot_dimension_numbers<[2], [1], [1], [2], [0, 0, 0, 1, 1, 2], [0], [0]>} : vector<2x16x16xf32>, vector<2x16x32xf32>, vector<2x16x32xf32> -> vector<2x16x32xf32>
    "tpu.trace_stop"() : () -> ()
    %c0_15 = arith.constant 0 : index
    %c0_16 = arith.constant 0 : index
    %c0_17 = arith.constant 0 : index
    %18 = vector.load %arg4[%c0_15, %c0_16, %c0_17] : memref<2x16x32xf32, #tpu.memory_space<vmem>>, vector<2x16x32xf32>
    tpu.vector_store %arg4[%c0_15, %c0_16, %c0_17], %17 {strides = array<i32>} : memref<2x16x32xf32, #tpu.memory_space<vmem>>, vector<2x16x32xf32>,
    return
  }
  func.func @transform_0(%arg0: i32) -> (i32, i32, i32) {
    %c0_i32 = arith.constant 0 : i32
    %c0_i32_0 = arith.constant 0 : i32
    %c0_i32_1 = arith.constant 0 : i32
    return %arg0, %c0_i32, %c0_i32_0 : i32, i32, i32
  }
  func.func @transform_1(%arg0: i32) -> (i32, i32, i32) {
    %c0_i32 = arith.constant 0 : i32
    %c0_i32_0 = arith.constant 0 : i32
    %c0_i32_1 = arith.constant 0 : i32
    return %arg0, %c0_i32, %c0_i32_0 : i32, i32, i32
  }
  func.func @transform_2(%arg0: i32) -> (i32, i32, i32) {
    %c0_i32 = arith.constant 0 : i32
    %c0_i32_0 = arith.constant 0 : i32
    %c0_i32_1 = arith.constant 0 : i32
    return %arg0, %c0_i32, %c0_i32_0 : i32, i32, i32
  }
  func.func @transform_3(%arg0: i32) -> (i32, i32, i32) {
    %c0_i32 = arith.constant 0 : i32
    %c0_i32_0 = arith.constant 0 : i32
    %c0_i32_1 = arith.constant 0 : i32
    return %arg0, %c0_i32, %c0_i32_0 : i32, i32, i32
  }
  func.func @transform_4(%arg0: i32) -> (i32, i32, i32) {
    %c0_i32 = arith.constant 0 : i32
    %c0_i32_0 = arith.constant 0 : i32
    %c0_i32_1 = arith.constant 0 : i32
    return %arg0, %c0_i32, %c0_i32_0 : i32, i32, i32
  }
}

</mosaic_0001>

<bundles_post_ra>
// kernel: tpu_custom_call.1
= control target key start
LH: loop header
LB: loop body
LE: loop exit
PB: predicated region body
PF: predicated region fallthrough
CT: control target
= control target key end

     0   :  { %s1618_s0 = inlined_call_operand.hbm [shape: f32[4,16,32], index: 0, kind: input, shape index: {}]   ;;  %s1619_s1 = inlined_call_operand.hbm [shape: f32[4,16,32], index: 1, kind: input, shape index: {}]   ;;  %s1620_s2 = inlined_call_operand.hbm [shape: f32[4,16,32], index: 2, kind: input, shape index: {}]   ;;  %s1621_s3 = inlined_call_operand.hbm [shape: f32[4,16,32], index: 3, kind: output, shape index: {0}]   ;;  %s1622_s4 = inlined_call_operand.hbm [shape: f32[4,16,16], index: 4, kind: output, shape index: {1}]  }
   0x1   :  { %1629 = sst [smem:[#allocation16_spill]] %s1618_s0 }
   0x2   :  { %1630 = sst [smem:[#allocation17_spill]] %s1619_s1 }
   0x3   :  { %10 = vsyncpa [#allocation3], 0 }
   0x4   :  { %12 = vsyncpa [#allocation3 + $0x1], 0 }
   0x5   :  { %13 = vsyncpa [#allocation6], 0 }
   0x6   :  { %15 = vsyncpa [#allocation6 + $0x1], 0 }
   0x7   :  { %16 = vsyncpa [#allocation4], 0 }
   0x8   :  { %18 = vsyncpa [#allocation4 + $0x1], 0 }
   0x9   :  { %19 = vsyncpa [#allocation10], 0 }
   0xa   :  { %21 = vsyncpa [#allocation10 + $0x1], 0  ;;  %s1299_s15 = smov 0   ;;  %s1301_s16 = smov 0  }
   0xb   :  { %s1303_s17 = smov 0   ;;  %s1305_s18 = smov 0  }
   0xc LB: > { %s1320_s19 = sadd.s32 4294967295, %s1263_s18   ;;  %s903_s20 = sadd.s32 4294967294, %s1263_s18   ;;  %s1263_s18 = sphi %s1305_s18, %s1652_s18   ;;  %s1259_s17 = sphi %s1303_s17, %s1651_s17   ;;  %s1255_s16 = sphi %s1301_s16, %s1650_s16   ;;  %s1251_s15 = sphi %s1299_s15, %s1649_s15  }
   0xd   : > { %s1324_s21 = sadd.s32 1, %s1263_s18   ;;  %s34_s22 = sadd.s32 1, %s1259_s17 }
   0xe   : > { %s31_s23 = ssub.s32 %s1263_s18, %s1324_s21  ;;  %p41_p0 = scmp.ne.s32.totalorder %s1259_s17, %s1255_s16 }
   0xf   : > { %p32_p1 = scmp.eq.s32.totalorder %s31_s23, 0  ;;  %p42_p2 = scmp.eq.s32.totalorder %s1263_s18, 0 }
  0x10   : > { %p47_p3 = scmp.ne.s32.totalorder %s1255_s16, %s1251_s15  ;;  %p48_p4 = scmp.eq.s32.totalorder %s1320_s19, 0 }
  0x11   : > { %s1336_s24 = scalar_select %p32_p1, %s1259_s17, %s34_s22  }
  0x12   : > { %p43_p5 = por %p42_p2, %p41_p0  ;;  %p1338_p6 = por %p48_p4, %p47_p3 }
  0x13   : > { %1631 = sst [smem:[#allocation15_spill]] %s1336_s24  ;;  %p123_p7 = scmp.eq.s32.totalorder %s1320_s19, 1 }
  0x14   : > { %s1632_s25 = scalar_select %p1338_p6, 1, 0 }
  0x15   : > { %p129_p8 = scmp.eq.s32.totalorder %s903_s20, 1  ;;  %p1027_p10 = scmp.lt.s32.totalorder %s1263_s18, 2 }
  0x16   : > { %p1345_p11 = por %p123_p7, %p41_p0  ;;  %s175_s28 = sand.u32 1, %s1259_s17  }
  0x17   : > { %p1349_p12 = por %p129_p8, %p47_p3  ;;  %s1355_s29 = sshll.u32 %s1263_s18, 9 }
  0x18   : > { %s1633_s26 = scalar_select %p1345_p11, 1, 0 }
  0x19   : > { %s1634_s27 = scalar_select %p1349_p12, 1, 0 }
  0x1a   : > { %s1359_s30 = sshll.u32 %s175_s28, 5  ;;  %p1361_p13 = pnand %p1027_p10, %p43_p5 }
  0x1b   : > { %s197_s6 = sand.u32 1, %s1263_s18   ;;  %s1636_s1 = sld [smem:[#allocation17_spill]] }
  0x1c   : > { %s201_s10 = scalar_lea.vmem [#allocation5], %s1359_s30  ;;  %s1376_s12 = scalar_lea.sflag [#allocation6], %s197_s6 }
  0x1d   : > { %s209_s11 = sshll.u32 %s201_s10, 4  ;;  %p1382_p2 = pneg %p1361_p13  ;;  %s1373_s11 = int_to_ptr.vmem [resolvable:$true] %s209_s11 }
  0x21   : > { %s1370_s9 = scalar_lea.hbm %s1636_s1, %s1355_s29  ;;  %s1086_s23 = scalar_lea.hbm %s1636_s1, 1024 }
  0x22   : > { %s1081_s13 = scalar_lea.hbm %s1370_s9, 512  ;;  %p1087_p5 = scmp.lt.s32.totalorder %s1370_s9, %s1636_s1 }
  0x23   : > { %p1082_p1 = scmp.ne.s32.totalorder %s1370_s9, %s1081_s13  ;;  %p1088_p7 = scmp.lt.s32.totalorder %s1086_s23, %s1081_s13 }
  0x25   : > { %p1084_p3 = pnand %p1382_p2, %p1082_p1  ;;  %p1089_p8 = por %p1088_p7, %p1087_p5 }
  0x27   : > { %p1085_p4 = pneg %p1084_p3 }
  0x29   : > { %p1090_p10 = pnand %p1089_p8, %p1085_p4 }
  0x2b   : > { %1093 = shalt.err (!%p1090_p10)
}
  0x2c   : > { %s1094_s6 = scalar_lea.vmem %s1373_s11, 512  ;;  %s1265_s10 = smov [#allocation5]  }
  0x2d   : > { %p1095_p9 = scmp.ne.s32.totalorder %s1373_s11, %s1094_s6  ;;  %s1099_s20 = sshll.u32 %s1265_s10, 4  ;;  %s1100_s20 = int_to_ptr.vmem [resolvable:$false] %s1099_s20 }
  0x2e   : > { %s1101_s22 = scalar_lea.vmem %s1100_s20, 1024  ;;  %p1102_p0 = scmp.lt.s32.totalorder %s1373_s11, %s1100_s20 }
  0x2f   : > { %p1097_p1 = pnand %p1095_p9, %p1382_p2  ;;  %p1103_p12 = scmp.lt.s32.totalorder %s1101_s22, %s1094_s6 }
  0x31   : > { %p1098_p3 = pneg %p1097_p1  ;;  %p1104_p11 = por %p1103_p12, %p1102_p0 }
  0x33   : > { %p1105_p6 = pnand %p1104_p11, %p1098_p3 }
  0x35   : > { %1108 = shalt.err (!%p1105_p6)
}
  0x36   : > { %s1625_s13 = smov 128   ;;  %s1627_s23 = smov 8  }
  0x37   : > { %1016 = dma.hbm_to_vmem [thread:$0]  (!%p1361_p13), %s1370_s9, 512, %s1373_s11, %s1376_s12, %s1625_s13, %s1625_s13, %s1627_s23  }
  0x38   : > { %p239_p9 = scmp.lt.s32.totalorder %s1263_s18, 3  ;;  %s1638_s0 = sld [smem:[#allocation16_spill]] }
  0x39   : > { %p1639_p6 = scmp.ge.s32.totalorder %s1263_s18, 1  ;;  %s179_s20 = scalar_lea.vmem [#allocation2], %s1359_s30 }
  0x3a   : > { %s187_s22 = sshll.u32 %s179_s20, 4  ;;  %s176_s9 = scalar_lea.sflag [#allocation3], %s175_s28  ;;  %s1422_s22 = int_to_ptr.vmem [resolvable:$true] %s187_s22 }
  0x3b   : > { %p1417_p11 = pnand %p1639_p6, %p239_p9 }
  0x3d   : > { %s1640_s10 = scalar_select %p1417_p11, 1, 0 }
  0x3e   : > { %s1413_s6 = scalar_lea.hbm %s1638_s0, %s1355_s29  ;;  %s1114_s13 = scalar_lea.hbm %s1638_s0, 1024 }
  0x3f   : > { %s1109_s11 = scalar_lea.hbm %s1413_s6, 512  ;;  %p1115_p5 = scmp.lt.s32.totalorder %s1413_s6, %s1638_s0 }
  0x40   : > { %p1110_p12 = scmp.ne.s32.totalorder %s1413_s6, %s1109_s11  ;;  %p1116_p7 = scmp.lt.s32.totalorder %s1114_s13, %s1109_s11 }
  0x42   : > { %p1112_p0 = pnand %p1110_p12, %p1382_p2  ;;  %p1117_p8 = por %p1116_p7, %p1115_p5 }
  0x44   : > { %p1113_p4 = pneg %p1112_p0 }
  0x46   : > { %p1118_p10 = pnand %p1117_p8, %p1113_p4 }
  0x48   : > { %1121 = shalt.err (!%p1118_p10)
}
  0x49   : > { %s1122_s28 = scalar_lea.vmem %s1422_s22, 512  ;;  %s1268_s20 = smov [#allocation2]  }
  0x4a   : > { %p1123_p1 = scmp.ne.s32.totalorder %s1422_s22, %s1122_s28  ;;  %s1127_s7 = sshll.u32 %s1268_s20, 4  ;;  %s1128_s7 = int_to_ptr.vmem [resolvable:$false] %s1127_s7 }
  0x4b   : > { %s1129_s8 = scalar_lea.vmem %s1128_s7, 1024  ;;  %p1130_p6 = scmp.lt.s32.totalorder %s1422_s22, %s1128_s7 }
  0x4c   : > { %p1125_p3 = pnand %p1123_p1, %p1382_p2  ;;  %p1131_p12 = scmp.lt.s32.totalorder %s1129_s8, %s1122_s28 }
  0x4e   : > { %p1126_p9 = pneg %p1125_p3  ;;  %p1132_p0 = por %p1131_p12, %p1130_p6 }
  0x50   : > { %p1133_p11 = pnand %p1132_p0, %p1126_p9 }
  0x52   : > { %1136 = shalt.err (!%p1133_p11)
}
  0x53   : > { %s1641_s1 = smov 8   ;;  %s1642_s13 = smov 128  }
  0x54   : > { %1013 = dma.hbm_to_vmem [thread:$0]  (!%p1361_p13), %s1413_s6, 512, %s1422_s22, %s176_s9, %s1642_s13, %s1642_s13, %s1641_s1  }
  0x55   : > { %s1453_s20 = scalar_lea.hbm %s1620_s2, %s1355_s29  ;;  %s223_s28 = scalar_lea.vmem [#allocation7], %s1359_s30 }
  0x56   : > { %s231_s7 = sshll.u32 %s223_s28, 4  ;;  %s1137_s8 = scalar_lea.hbm %s1453_s20, 512  ;;  %s232_s7 = int_to_ptr.vmem [resolvable:$true] %s231_s7 }
  0x57   : > { %p1138_p11 = scmp.ne.s32.totalorder %s1453_s20, %s1137_s8  ;;  %s1142_s6 = scalar_lea.hbm %s1620_s2, 1024 }
  0x58   : > { %p1143_p7 = scmp.lt.s32.totalorder %s1453_s20, %s1620_s2  ;;  %p1144_p8 = scmp.lt.s32.totalorder %s1142_s6, %s1137_s8 }
  0x59   : > { %p1140_p4 = pnand %p1138_p11, %p1382_p2 }
  0x5a   : > { %p1145_p10 = por %p1144_p8, %p1143_p7 }
  0x5b   : > { %p1141_p5 = pneg %p1140_p4 }
  0x5d   : > { %p1146_p1 = pnand %p1145_p10, %p1141_p5 }
  0x5f   : > { %1149 = shalt.err (!%p1146_p1)
}
  0x60   : > { %s1150_s29 = scalar_lea.vmem %s232_s7, 512  ;;  %s1269_s30 = smov [#allocation7]  }
  0x61   : > { %p1151_p3 = scmp.ne.s32.totalorder %s232_s7, %s1150_s29  ;;  %s1155_s23 = sshll.u32 %s1269_s30, 4  ;;  %s1156_s23 = int_to_ptr.vmem [resolvable:$false] %s1155_s23 }
  0x62   : > { %s1157_s11 = scalar_lea.vmem %s1156_s23, 1024  ;;  %p1158_p12 = scmp.lt.s32.totalorder %s232_s7, %s1156_s23 }
  0x63   : > { %p1153_p9 = pnand %p1151_p3, %p1382_p2  ;;  %p1159_p0 = scmp.lt.s32.totalorder %s1157_s11, %s1150_s29 }
  0x65   : > { %p1154_p6 = pneg %p1153_p9  ;;  %p1160_p11 = por %p1159_p0, %p1158_p12 }
  0x67   : > { %p1161_p4 = pnand %p1160_p11, %p1154_p6 }
  0x69   : > { %1164 = shalt.err (!%p1161_p4)
}
  0x6a   : > { %1019 = dma.hbm_to_vmem [thread:$0]  (!%p1361_p13), %s1453_s20, 512, %s232_s7, %s1376_s12, %s1642_s13, %s1642_s13, %s1641_s1  }
  0x6b   : > { %p1643_p2 = scmp.ne.s32.totalorder %s1640_s10, 0 }
  0x6c   : > { %s1479_s0 = sand.u32 (!%p1643_p2), 1, %s1255_s16   ;;  %p1644_p5 = scmp.ne.s32.totalorder (!%p1643_p2), %s1632_s25, 0 }
  0x6d   : > { %243 = sbr.rel (%p1643_p2) target bundleno = 852 (0x354), region = 32  ;;  %s1482_s24 = sshll.u32 (!%p1643_p2), %s1479_s0, 5 }
  0x6e   : > { %s246_s14 = scalar_lea.sflag (!%p1643_p2), [#allocation3], %s1479_s0  ;;  %s249_s5 = scalar_lea.vmem (!%p1643_p2), [#allocation2], %s1482_s24 }
  0x72   : > { %1234 = dma.done.wait (%p1644_p5), %s246_s14, 512  }
  0x73   : > { %1236 = vsyncadd (%p1644_p5), %s246_s14, 4294966784  ;;  %s254_s12 = sand.u32 1, %s1320_s19   ;;  %s258_s1 = scalar_lea.vmem [#allocation5], %s1482_s24 }
  0x74   : > { %s255_s10 = scalar_lea.sflag [#allocation6], %s254_s12 }
  0x75   : > { %1238 = dma.done.wait (%p1644_p5), %s255_s10, 1024  }
  0x76   : > { %1240 = vsyncadd (%p1644_p5), %s255_s10, 4294966272  ;;  %vm324_vm0 = vcmask 261120   ;;  %v317_v0 = vld [vmem:[%s258_s1 + $0x8] sm:$0xff]  ;;  %v319_v1 = vld [vmem:[%s258_s1 + $0x18] sm:$0xff]  ;;  %vm503_vm1 = vcmask 130048   ;;  %s267_s25 = scalar_lea.vmem [#allocation7], %s1482_s24 }
  0x77   : > { %v316_v2 = vld [vmem:[%s258_s1] sm:$0xff]  ;;  %972 = vmatprep.subr.msk.mxu0 %vm324_vm0, %v317_v0  ;;  %979 = vmatprep.subr.msk.mxu1 %vm324_vm0, %v319_v1  ;;  %v318_v3 = vld [vmem:[%s258_s1 + $0x10] sm:$0xff]  ;;  %v313_v6 = vld [vmem:[%s249_s5 + $0x8] sm:$0xff]  ;;  %s306_s13 = scalar_lea.vmem [#allocation9], %s1482_s24  ;;  %s953_s20 = sshll.u32 %s1320_s19, 9 }
  0x78   : > { %v312_v4 = vld [vmem:[%s249_s5] sm:$0xff]  ;;  %973 = vmatpush3.xpose.msk.msra.mxu0 %vm324_vm0, %v317_v0  ;;  %980 = vmatpush3.xpose.msk.msra.mxu1 %vm324_vm0, %v319_v1  ;;  %v314_v5 = vld [vmem:[%s249_s5 + $0x10] sm:$0xff]  ;;  %v315_v7 = vld [vmem:[%s249_s5 + $0x18] sm:$0xff]  ;;  %s1532_s8 = scalar_lea.hbm %s1622_s4, %s953_s20  ;;  %s755_s6 = sshll.u32 %s306_s13, 4  ;;  %s1534_s6 = int_to_ptr.vmem [resolvable:$true] %s755_s6 }
  0x79   : > { %974 = vmatprep.subr.msk.mxu0 %vm324_vm0, %v316_v2  ;;  %981 = vmatprep.subr.msk.mxu1 %vm324_vm0, %v318_v3  ;;  %v321_v40 = vld [vmem:[%s267_s25 + $0x8] sm:$0xff]  ;;  %v320_v41 = vld [vmem:[%s267_s25] sm:$0xff]  ;;  %v323_v42 = vld [vmem:[%s267_s25 + $0x18] sm:$0xff]  ;;  %s724_s22 = scalar_lea.sflag [#allocation10], %s1479_s0  ;;  %s1165_s9 = scalar_lea.vmem %s1534_s6, 512 }
  0x7a   : > { %976 = vmatprep.mubr.msk.f32.mxu0 %vm324_vm0, %v312_v4  ;;  %983 = vmatprep.mubr.msk.f32.mxu1 %vm324_vm0, %v314_v5  ;;  %v322_v43 = vld [vmem:[%s267_s25 + $0x10] sm:$0xff]  ;;  %p1166_p13 = scmp.ne.s32.totalorder %s1534_s6, %s1165_s9  ;;  %p1645_p7 = scmp.ne.s32.totalorder %s1633_s26, 0 }
  0x7b   : > { %s1270_s29 = smov [#allocation9]  }
  0x7c   : > { %975 = vmatpush3.xpose.msk.msra.mxu0 %vm324_vm0, %v316_v2  ;;  %982 = vmatpush3.xpose.msk.msra.mxu1 %vm324_vm0, %v318_v3  ;;  %p1167_p8 = pnand %p1166_p13, %p1645_p7  ;;  %s1169_s30 = sshll.u32 %s1270_s29, 4  ;;  %s1170_s30 = int_to_ptr.vmem [resolvable:$false] %s1169_s30 }
  0x7d   : > { %986 = vmatprep.subr.mxu0 %v321_v40  ;;  %993 = vmatprep.subr.mxu1 %v323_v42  ;;  %s1171_s23 = scalar_lea.vmem %s1170_s30, 1024  ;;  %p1172_p1 = scmp.lt.s32.totalorder %s1534_s6, %s1170_s30 }
  0x7e   : > { %p1168_p10 = pneg %p1167_p8  ;;  %p1173_p3 = scmp.lt.s32.totalorder %s1171_s23, %s1165_s9 }
  0x7f   : > { %977 = vmatmul.mubr.msk.f32.vlgmr.msra.gmra.mxu0 %vm324_vm0, %v313_v6  ;;  %984 = vmatmul.mubr.msk.f32.vlgmr.msra.gmra.mxu1 %vm324_vm0, %v315_v7 }
  0x80   : > { %987 = vmatpush3.msra.mxu0 %v321_v40  ;;  %994 = vmatpush3.msra.mxu1 %v323_v42  ;;  %p1174_p9 = por %p1173_p3, %p1172_p1 }
  0x81   : > { %988 = vmatprep.subr.mxu0 %v320_v41  ;;  %995 = vmatprep.subr.mxu1 %v322_v43 }
  0x82   : > { %989 = vmatpush3.msra.mxu0 %v320_v41  ;;  %996 = vmatpush3.msra.mxu1 %v322_v43  ;;  %p1175_p6 = pnand %p1174_p9, %p1168_p10 }
 0x13f   : > { %v978_v8 = vpop.f32.mrf.mxu0  ;;  %v985_v9 = vpop.f32.mrf.mxu1 }
 0x140   : > { %v500_v10 = vmul.f32 0.17677669, %v978_v8  ;;  %v502_v11 = vmul.f32 0.17677669, %v985_v9 }
 0x141   : > { %v403_v12 = vpop.f32.mrf.mxu0  ;;  %v490_v13 = vpop.f32.mrf.mxu1 }
 0x142   : > { %v499_v14 = vmul.f32 0.17677669, %v403_v12  ;;  %v507_v15 = vsel %vm503_vm1, %v500_v10, -inf  ;;  %v501_v16 = vmul.f32 0.17677669, %v490_v13  ;;  %v513_v18 = vsel %vm503_vm1, %v502_v11, -inf }
 0x143   : > { %508 = vmax.xlane.f32.xlu1 %v507_v15 }
 0x144   : > { %v504_v17 = vsel %vm503_vm1, %v499_v14, -inf  ;;  %v510_v19 = vsel %vm503_vm1, %v501_v16, -inf }
 0x145   : > { %505 = vmax.xlane.f32.xlu0 %v504_v17 }
 0x147   : > { %514 = vmax.xlane.f32.xlu1 %v513_v18 }
 0x149   : > { %511 = vmax.xlane.f32.xlu0 %v510_v19 }
 0x1cc   : > { %v509_v20 = vpop.xlane.xlu1 %508 }
 0x1cd   : > { %v517_v21 = vsub.f32 %v500_v10, %v509_v20 }
 0x1ce   : > { %v506_v22 = vpop.xlane.xlu0 %505 }
 0x1cf   : > { %v516_v23 = vsub.f32 %v499_v14, %v506_v22  ;;  %v522_v25 = vmul.f32 1.442695, %v517_v21 }
 0x1d0   : > { %v515_v24 = vpop.xlane.xlu1 %514 }
 0x1d1   : > { %v520_v26 = vmul.f32 1.442695, %v516_v23  ;;  %v519_v27 = vsub.f32 %v502_v11, %v515_v24 }
 0x1d2   : > { %v512_v28 = vpop.xlane.xlu0 %511 }
 0x1d3   : > { %1065 = vpow2.f32 %v520_v26  ;;  %v518_v29 = vsub.f32 %v501_v16, %v512_v28  ;;  %v526_v30 = vmul.f32 1.442695, %v519_v27 }
 0x1d4   : > { %1067 = vpow2.f32 %v522_v25 }
 0x1d5   : > { %v524_v31 = vmul.f32 1.442695, %v518_v29 }
 0x1d7   : > { %1069 = vpow2.f32 %v524_v31 }
 0x1d8   : > { %1071 = vpow2.f32 %v526_v30 }
 0x1e0   : > { %v1066_v32 = vpop.eup %1065 }
 0x1e1   : > { %v528_v33 = vsel %vm503_vm1, %v1066_v32, 0.0  ;;  %v1068_v34 = vpop.eup %1067 }
 0x1e2   : > { %529 = vadd.xlane.f32.xlu0 %v528_v33  ;;  %v531_v36 = vsel %vm503_vm1, %v1068_v34, 0.0 }
 0x1e4   : > { %v1070_v35 = vpop.eup %1069 }
 0x1e5   : > { %v534_v37 = vsel %vm503_vm1, %v1070_v35, 0.0  ;;  %v1072_v38 = vpop.eup %1071 }
 0x1e6   : > { %532 = vadd.xlane.f32.xlu0 %v531_v36  ;;  %535 = vadd.xlane.f32.xlu1 %v534_v37  ;;  %v537_v39 = vsel %vm503_vm1, %v1072_v38, 0.0 }
 0x1ea   : > { %538 = vadd.xlane.f32.xlu1 %v537_v39 }
 0x26b   : > { %v530_v44 = vpop.xlane.xlu0 %529 }
 0x26c   : > { %1073 = vrcp.f32 %v530_v44 }
 0x26f   : > { %v536_v45 = vpop.xlane.xlu1 %535  ;;  %v533_v46 = vpop.xlane.xlu0 %532 }
 0x270   : > { %1075 = vrcp.f32 %v536_v45 }
 0x271   : > { %1077 = vrcp.f32 %v533_v46 }
 0x273   : > { %v539_v47 = vpop.xlane.xlu1 %538 }
 0x274   : > { %1079 = vrcp.f32 %v539_v47 }
 0x279   : > { %v1074_v48 = vpop.eup %1073 }
 0x27a   : > { %v544_v49 = vmul.f32 %v1074_v48, %v1066_v32 }
 0x27c   : > { %548 = vst.msk [vmem:[%s306_s13] sm:$0xff] %vm503_vm1, %v544_v49  ;;  %990 = vmatprep.mubr.msk.f32.mxu0 %vm503_vm1, %v544_v49 }
 0x27d   : > { %v1076_v50 = vpop.eup %1075 }
 0x27e   : > { %v1078_v51 = vpop.eup %1077  ;;  %v546_v52 = vmul.f32 %v1076_v50, %v1070_v35 }
 0x27f   : > { %v545_v53 = vmul.f32 %v1078_v51, %v1068_v34 }
 0x280   : > { %550 = vst.msk [vmem:[%s306_s13 + $0x10] sm:$0xff] %vm503_vm1, %v546_v52  ;;  %997 = vmatprep.mubr.msk.f32.mxu1 %vm503_vm1, %v546_v52 }
 0x281   : > { %v1080_v54 = vpop.eup %1079  ;;  %549 = vst.msk [vmem:[%s306_s13 + $0x8] sm:$0xff] %vm503_vm1, %v545_v53  ;;  %991 = vmatmul.mubr.msk.f32.vlgmr.msra.gmra.mxu0 %vm503_vm1, %v545_v53 }
 0x282   : > { %v547_v55 = vmul.f32 %v1080_v54, %v1072_v38 }
 0x284   : > { %551 = vst.msk [vmem:[%s306_s13 + $0x18] sm:$0xff] %vm503_vm1, %v547_v55  ;;  %998 = vmatmul.mubr.msk.f32.vlgmr.msra.gmra.mxu1 %vm503_vm1, %v547_v55 }
 0x285   : > { %1178 = shalt.err (!%p1175_p6)
}
 0x286   : > { %s1179_s11 = scalar_lea.hbm %s1532_s8, 512  ;;  %s1183_s12 = scalar_lea.hbm %s1622_s4, 1024 }
 0x287   : > { %p1180_p12 = scmp.ne.s32.totalorder %s1532_s8, %s1179_s11  ;;  %p1184_p4 = scmp.lt.s32.totalorder %s1532_s8, %s1622_s4 }
 0x288   : > { %p1185_p2 = scmp.lt.s32.totalorder %s1183_s12, %s1179_s11 }
 0x289   : > { %p1181_p0 = pnand %p1180_p12, %p1645_p7 }
 0x28a   : > { %p1186_p5 = por %p1185_p2, %p1184_p4 }
 0x28b   : > { %p1182_p11 = pneg %p1181_p0 }
 0x28d   : > { %p1187_p13 = pnand %p1186_p5, %p1182_p11 }
 0x28f   : > { %1190 = shalt.err (!%p1187_p13)
}
 0x290   : > { %s1271_s25 = smov 128   ;;  %s1272_s13 = smov 8  }
 0x291   : > { %1007 = dma.vmem_to_hbm [thread:$0]  (%p1645_p7), %s1534_s6, 512, %s1532_s8, %s724_s22, %s1271_s25, %s1271_s25, %s1272_s13  }
 0x292   : > { %s299_s28 = scalar_lea.vmem [#allocation8], %s1482_s24  ;;  %s1573_s6 = scalar_lea.hbm %s1621_s3, %s953_s20 }
 0x293   : > { %s738_s7 = sshll.u32 %s299_s28, 4  ;;  %s719_s24 = scalar_lea.sflag [#allocation4], %s1479_s0  ;;  %s1564_s7 = int_to_ptr.vmem [resolvable:$true] %s738_s7 }
 0x294   : > { %s1191_s22 = scalar_lea.vmem %s1564_s7, 512  ;;  %s1273_s29 = smov [#allocation8]  }
 0x295   : > { %p1192_p8 = scmp.ne.s32.totalorder %s1564_s7, %s1191_s22  ;;  %s1195_s30 = sshll.u32 %s1273_s29, 4  ;;  %s1196_s30 = int_to_ptr.vmem [resolvable:$false] %s1195_s30 }
 0x296   : > { %s1197_s23 = scalar_lea.vmem %s1196_s30, 1024  ;;  %p1198_p3 = scmp.lt.s32.totalorder %s1564_s7, %s1196_s30 }
 0x297   : > { %p1193_p10 = pnand %p1192_p8, %p1645_p7  ;;  %p1199_p9 = scmp.lt.s32.totalorder %s1197_s23, %s1191_s22 }
 0x299   : > { %p1194_p1 = pneg %p1193_p10  ;;  %p1200_p6 = por %p1199_p9, %p1198_p3 }
 0x29b   : > { %p1201_p12 = pnand %p1200_p6, %p1194_p1 }
 0x341   : > { %v992_v56 = vpop.f32.mrf.mxu0 }
 0x342   : > { %715 = vst.msk [vmem:[%s299_s28 + $0x8] sm:$0xff] %vm324_vm0, %v992_v56 }
 0x343   : > { %v624_v57 = vpop.f32.mrf.mxu0 }
 0x344   : > { %714 = vst.msk [vmem:[%s299_s28] sm:$0xff] %vm324_vm0, %v624_v57  ;;  %v999_v58 = vpop.f32.mrf.mxu1 }
 0x345   : > { %717 = vst.msk [vmem:[%s299_s28 + $0x18] sm:$0xff] %vm324_vm0, %v999_v58 }
 0x346   : > { %v705_v59 = vpop.f32.mrf.mxu1 }
 0x347   : > { %716 = vst.msk [vmem:[%s299_s28 + $0x10] sm:$0xff] %vm324_vm0, %v705_v59 }
 0x348   : > { %1204 = shalt.err (!%p1201_p12)
}
 0x349   : > { %s1205_s19 = scalar_lea.hbm %s1573_s6, 512  ;;  %s1209_s11 = scalar_lea.hbm %s1621_s3, 1024 }
 0x34a   : > { %p1206_p0 = scmp.ne.s32.totalorder %s1573_s6, %s1205_s19  ;;  %p1210_p2 = scmp.lt.s32.totalorder %s1573_s6, %s1621_s3 }
 0x34b   : > { %p1211_p5 = scmp.lt.s32.totalorder %s1209_s11, %s1205_s19 }
 0x34c   : > { %p1207_p11 = pnand %p1206_p0, %p1645_p7 }
 0x34d   : > { %p1212_p13 = por %p1211_p5, %p1210_p2 }
 0x34e   : > { %p1208_p4 = pneg %p1207_p11 }
 0x350   : > { %p1213_p8 = pnand %p1212_p13, %p1208_p4 }
 0x352   : > { %1216 = shalt.err (!%p1213_p8)
}
 0x353   : > { %1006 = dma.vmem_to_hbm [thread:$0]  (%p1645_p7), %s1564_s7, 512, %s1573_s6, %s719_s24, %s1271_s25, %s1271_s25, %s1272_s13  }
 0x354 PF: > { %s770_s12 = sand.u32 1, %s1251_s15   ;;  %p1646_p10 = scmp.ne.s32.totalorder %s1634_s27, 0 }
 0x355   : > { %p1647_p1 = scmp.ge.s32.totalorder %s1263_s18, 2  ;;  %s771_s10 = scalar_lea.sflag [#allocation4], %s770_s12 }
 0x357   : > { %p1021_p3 = pnand %p1647_p1, %p1646_p10 }
 0x359   : > { %p1022_p9 = pneg %p1021_p3 }
 0x35b   : > { %1242 = dma.done.wait (%p1022_p9), %s771_s10, 512  }
 0x35c   : > { %1244 = vsyncadd (%p1022_p9), %s771_s10, 4294966784  ;;  %s780_s1 = scalar_lea.sflag [#allocation10], %s770_s12 }
 0x35d   : > { %1246 = dma.done.wait (%p1022_p9), %s780_s1, 512  }
 0x35e   : > { %1248 = vsyncadd (%p1022_p9), %s780_s1, 4294966784  ;;  %s1648_s26 = sld [smem:[#allocation15_spill]]  ;;  %p24_p7 = scmp.ge.s32.totalorder %s1324_s21, 4  }
 0x35f   : > { %s1649_s15 = smov %s1255_s16  ;;  %s1650_s16 = smov %s1259_s17 }
 0x360   : > { %s1652_s18 = smov %s1324_s21  ;;  %26 = sbr.rel (!%p24_p7) target bundleno = 12 (0xc), region = 118 }
 0x364   : > { %s1651_s17 = smov %s1648_s26 }
 0x365   :  { %785 = vsyncpa [#allocation3], 1 }
 0x366   :  { %787 = vsyncpa [#allocation3 + $0x1], 1 }
 0x367   :  { %788 = vsyncpa [#allocation6], 1 }
 0x368   :  { %790 = vsyncpa [#allocation6 + $0x1], 1 }
 0x369   :  { %791 = vsyncpa [#allocation4], 1 }
 0x36a   :  { %793 = vsyncpa [#allocation4 + $0x1], 1 }
 0x36b   :  { %794 = vsyncpa [#allocation10], 1 }
 0x36c   :  { %796 = vsyncpa [#allocation10 + $0x1], 1 }

</bundles_post_ra>
